<compile_context>
chip_gen: v7x
topology: tpu7x:2x2x1
jax: 0.10.0
libtpu: 0.0.40
codegen_flags: <defaults>
</compile_context>

<pallas_src>
from functools import partial

import numpy as np
import jax
import jax.numpy as jnp
from jax import lax
from jax.experimental import pallas as pl
from jax.experimental.pallas import tpu as pltpu

MY_INF = 1000000000000.0


def _round_up(x, m):
    return (x + m - 1) // m * m


def _vmem_capacity_bytes():
    try:
        return int(pltpu.get_tpu_info().vmem_capacity_bytes)
    except Exception:
        return 64 * 1024 * 1024  # v7x floor; safe lower bound on every generation


# ----------------------------------------------------------------------------
# One-time parameter preparation (do at load time, NOT per forward call).
# Folds 1/sqrt(d_k) into Wq/bq and casts all weights to the MXU compute dtype.
# ----------------------------------------------------------------------------
def prepare_params(params, heads, compute_dtype=jnp.bfloat16):
    D = params["wq"].shape[0]
    assert D % heads == 0
    d_k = D // heads
    scale = jnp.float32(d_k ** -0.5)
    cd = np.dtype(compute_dtype)
    return {
        "wq": (params["wq"] * scale).astype(cd),
        "bq": (params["bq"] * scale).astype(cd),
        "wk": params["wk"].astype(cd), "bk": params["bk"].astype(cd),
        "wv": params["wv"].astype(cd), "bv": params["bv"].astype(cd),
        "wo": params["wo"].astype(cd), "bo": params["bo"].astype(cd),
        "heads": heads, "compute_dtype": cd,
    }


# ----------------------------------------------------------------------------
# Kernel 1: tiled K/V projection (grid = (batch, kv seq tiles), weights resident).
# ----------------------------------------------------------------------------
def _kv_proj_kernel(k_ref, v_ref, wk_ref, bk_ref, wv_ref, bv_ref, ko_ref, vo_ref):
    k = k_ref[0]
    v = v_ref[0]
    ko_ref[0] = (jnp.dot(k, wk_ref[...], preferred_element_type=jnp.float32)
                 + bk_ref[...]).astype(ko_ref.dtype)
    vo_ref[0] = (jnp.dot(v, wv_ref[...], preferred_element_type=jnp.float32)
                 + bv_ref[...]).astype(vo_ref.dtype)


# ----------------------------------------------------------------------------
# Kernel 2: flash attention with fused Q projection and fused output projection.
# Grid: (batch, q_tiles, kv_tiles); kv axis is the (innermost, "arbitrary") reduction.
# ----------------------------------------------------------------------------
def _flash_mha_kernel(kv_len_ref, *refs, heads, d_k, causal, use_col_mask,
                      use_dense_mask, compute_dtype):
    if use_dense_mask:
        (mask_ref, q_ref, k_ref, v_ref, wq_ref, bq_ref, wo_ref, bo_ref,
         o_ref, qp_ref, m_ref, l_ref, acc_ref) = refs
    else:
        mask_ref = None
        (q_ref, k_ref, v_ref, wq_ref, bq_ref, wo_ref, bo_ref,
         o_ref, qp_ref, m_ref, l_ref, acc_ref) = refs

    b = pl.program_id(0)
    qi = pl.program_id(1)
    ki = pl.program_id(2)
    tq = q_ref.shape[1]
    tk = k_ref.shape[1]
    approx_recip = np.dtype(compute_dtype) != np.dtype(np.float32)

    # ---- init (once per (batch, q_tile)): fused Q projection + state reset ----
    @pl.when(ki == 0)
    def _init():
        # 1/sqrt(d_k) is already folded into wq/bq (prepare_params).
        q = q_ref[0]                                                  # (tq, D)
        qp = jnp.dot(q, wq_ref[...], preferred_element_type=jnp.float32) + bq_ref[...]
        qp_ref[...] = qp.astype(compute_dtype)
        m_ref[...] = jnp.full(m_ref.shape, -jnp.inf, jnp.float32)
        l_ref[...] = jnp.zeros(l_ref.shape, jnp.float32)
        acc_ref[...] = jnp.zeros(acc_ref.shape, jnp.float32)

    qp = qp_ref[...]                                                  # (tq, D) cd
    k = k_ref[0]                                                      # (tk, D) cd
    v = v_ref[0]                                                      # (tk, D) cd

    # ---- additive mask bias, built once per tile and shared across all heads ----
    bias = None
    if use_col_mask or causal or use_dense_mask:
        masked = None
        if use_col_mask or causal:
            col = lax.broadcasted_iota(jnp.int32, (tq, tk), 1) + ki * tk
        if use_col_mask:
            masked = col >= kv_len_ref[b]
        if causal:
            row = lax.broadcasted_iota(jnp.int32, (tq, tk), 0) + qi * tq
            cm = col > row
            masked = cm if masked is None else (masked | cm)
        if use_dense_mask:
            dm = mask_ref[0] != 0
            masked = dm if masked is None else (masked | dm)
        bias = jnp.where(masked, jnp.float32(-MY_INF), jnp.float32(0.0))

    # ---- online softmax, static head loop over lane slices (no relayouts) ----
    # Fully-masked rows end up with uniform attention over keys (exp(0) everywhere),
    # matching masked_fill(-1e12)+softmax in the torch reference.
    for h in range(heads):
        sl = slice(h * d_k, (h + 1) * d_k)
        s = lax.dot_general(qp[:, sl], k[:, sl],
                            dimension_numbers=(((1,), (1,)), ((), ())),
                            preferred_element_type=jnp.float32)       # (tq, tk)
        if bias is not None:
            s = s + bias
        m_prev = m_ref[h]                                             # (tq, 1)
        m_new = jnp.maximum(m_prev, jnp.max(s, axis=-1, keepdims=True))
        alpha = jnp.exp(m_prev - m_new)
        p = jnp.exp(s - m_new)                                        # f32
        l_ref[h] = alpha * l_ref[h] + jnp.sum(p, axis=-1, keepdims=True)
        pv = jnp.dot(p.astype(compute_dtype), v[:, sl],
                     preferred_element_type=jnp.float32)              # (tq, d_k)
        acc_ref[h] = alpha * acc_ref[h] + pv
        m_ref[h] = m_new

    # ---- finalize: normalize and apply the output projection per head slice of Wo,
    #      so the (tq, D) concat never materializes ----
    @pl.when(ki == pl.num_programs(2) - 1)
    def _finalize():
        wo = wo_ref[...]                                              # (D, D) cd
        total = None
        for h in range(heads):
            inv = pl.reciprocal(l_ref[h], approx=approx_recip)        # (tq, 1)
            oh = (acc_ref[h] * inv).astype(compute_dtype)             # (tq, d_k)
            contrib = jnp.dot(oh, wo[h * d_k:(h + 1) * d_k, :],
                              preferred_element_type=jnp.float32)     # (tq, D)
            total = contrib if total is None else total + contrib
        o_ref[0] = (total + bo_ref[...]).astype(o_ref.dtype)


# ----------------------------------------------------------------------------
# Wrapper.  mask handling (all equivalent to torch masked_fill(mask, -MY_INF)):
#   mask=None, causal=False, kv_lens=None  -> no masking ops at all
#   causal=True                            -> causal mask generated in-kernel (no DMA)
#   kv_lens=(n,) int array                 -> key-padding mask generated in-kernel
#   mask=bool array (n,Lq,Lk)/(n,1,Lq,Lk)  -> dense mask, DMA'd as int8
# ----------------------------------------------------------------------------
def multi_head_attention(q, k, v, prepared, *, mask=None, causal=False,
                         kv_lens=None, q_tile=256, kv_tile=512):
    heads = prepared["heads"]
    cd = prepared["compute_dtype"]
    n, Lq, D = q.shape
    Lk = k.shape[1]
    assert q.shape[0] == k.shape[0] == v.shape[0]
    assert k.shape[1] == v.shape[1]
    assert k.shape[2] == D and v.shape[2] == D and D % heads == 0
    d_k = D // heads
    out_dtype = q.dtype
    itemsize = np.dtype(cd).itemsize

    # ---- tile sizes, clamped to the sequence and a per-generation VMEM budget ----
    tq = min(q_tile, _round_up(Lq, 8))
    tk = min(kv_tile, _round_up(Lk, 8))
    cap = _vmem_capacity_bytes()

    def _vmem_estimate(tq_, tk_):
        wbytes = 2 * 2 * (D * D + D) * itemsize                 # wq,wo(+bias), dbl-buf
        blk = 2 * (tq_ * D + 2 * tk_ * D) * itemsize            # q,K,V blocks, dbl-buf
        blk += 2 * tq_ * D * np.dtype(out_dtype).itemsize       # output block
        if mask is not None:
            blk += 2 * tq_ * tk_                                  # int8 mask block
        scratch = tq_ * D * itemsize + heads * tq_ * (d_k + 2) * 4
        live = 4 * tq_ * tk_ * 4                                  # s/p/bias working vregs
        return wbytes + blk + scratch + live

    while _vmem_estimate(tq, tk) > cap // 3 and tk > 128:
        tk = max(128, _round_up(tk // 2, 8))
    while _vmem_estimate(tq, tk) > cap // 3 and tq > 64:
        tq = max(64, _round_up(tq // 2, 8))

    Lq_pad = _round_up(Lq, tq)
    Lk_pad = _round_up(Lk, tk)

    def _pad_seq(x, L_pad):
        L = x.shape[1]
        return x if L == L_pad else jnp.pad(x, ((0, 0), (0, L_pad - L), (0, 0)))

    q_p = _pad_seq(q, Lq_pad).astype(cd)
    k_p = _pad_seq(k, Lk_pad).astype(cd)
    v_p = _pad_seq(v, Lk_pad).astype(cd)

    # Key-column validity (covers both user kv_lens and tiling padding).
    use_col_mask = (kv_lens is not None) or (Lk_pad != Lk)
    if kv_lens is None:
        lens = jnp.full((n,), Lk, jnp.int32)
    else:
        lens = jnp.asarray(kv_lens).astype(jnp.int32).reshape((n,))

    # Dense bool mask (head-shared), DMA'd as int8.
    # TODO(synk): per-head (n, H, Lq, Lk) masks not supported; the torch module is
    #             only used with head-shared masks.
    use_dense = mask is not None
    if use_dense:
        m = jnp.asarray(mask)
        if m.ndim == 4:
            m = m[:, 0]
        m = jnp.broadcast_to(m, (n, Lq, Lk)).astype(jnp.int8)
        if (Lq_pad, Lk_pad) != (Lq, Lk):
            m = jnp.pad(m, ((0, 0), (0, Lq_pad - Lq), (0, Lk_pad - Lk)))
        mask_i8 = m

    # ---- pass 1: K/V projection (not redone per q tile) ----
    seq_spec = pl.BlockSpec((1, tk, D), lambda b, s: (b, s, 0))
    w_spec = pl.BlockSpec((D, D), lambda b, s: (0, 0))
    b_spec = pl.BlockSpec((1, D), lambda b, s: (0, 0))
    K_p, V_p = pl.pallas_call(
        _kv_proj_kernel,
        out_shape=(jax.ShapeDtypeStruct((n, Lk_pad, D), cd),
                   jax.ShapeDtypeStruct((n, Lk_pad, D), cd)),
        grid=(n, Lk_pad // tk),
        in_specs=[seq_spec, seq_spec, w_spec, b_spec, w_spec, b_spec],
        out_specs=(seq_spec, seq_spec),
        compiler_params=pltpu.CompilerParams(
            dimension_semantics=("parallel", "parallel")),
    )(k_p, v_p, prepared["wk"], prepared["bk"], prepared["wv"], prepared["bv"])

    # ---- pass 2: flash attention (+ fused Q projection and output projection) ----
    def _q_idx(b, qi, ki, lens_ref):
        return (b, qi, 0)

    def _kv_idx(b, qi, ki, lens_ref):
        return (b, ki, 0)

    def _const_idx(b, qi, ki, lens_ref):
        return (0, 0)

    def _mask_idx(b, qi, ki, lens_ref):
        return (b, qi, ki)

    in_specs = []
    args = []
    if use_dense:
        in_specs.append(pl.BlockSpec((1, tq, tk), _mask_idx))
        args.append(mask_i8)
    in_specs += [pl.BlockSpec((1, tq, D), _q_idx),
                 pl.BlockSpec((1, tk, D), _kv_idx),
                 pl.BlockSpec((1, tk, D), _kv_idx),
                 pl.BlockSpec((D, D), _const_idx),
                 pl.BlockSpec((1, D), _const_idx),
                 pl.BlockSpec((D, D), _const_idx),
                 pl.BlockSpec((1, D), _const_idx)]
    args += [q_p, K_p, V_p, prepared["wq"], prepared["bq"],
             prepared["wo"], prepared["bo"]]

    need = _vmem_estimate(tq, tk)
    vmem_limit = None
    if need > 16 * 2 ** 20:                # only raise beyond the smallest scoped default
        vmem_limit = int(min(cap - 2 ** 20, 2 * need))

    kernel = partial(_flash_mha_kernel, heads=heads, d_k=d_k, causal=causal,
                     use_col_mask=use_col_mask, use_dense_mask=use_dense,
                     compute_dtype=cd)

    out = pl.pallas_call(
        kernel,
        out_shape=jax.ShapeDtypeStruct((n, Lq_pad, D), out_dtype),
        grid_spec=pltpu.PrefetchScalarGridSpec(
            num_scalar_prefetch=1,
            grid=(n, Lq_pad // tq, Lk_pad // tk),
            in_specs=in_specs,
            out_specs=pl.BlockSpec((1, tq, D), _q_idx),
            scratch_shapes=[
                pltpu.VMEM((tq, D), cd),                      # projected, scaled Q tile
                pltpu.VMEM((heads, tq, 1), jnp.float32),      # running max  m
                pltpu.VMEM((heads, tq, 1), jnp.float32),      # running sum  l
                pltpu.VMEM((heads, tq, d_k), jnp.float32),    # per-head numerator
            ]),
        compiler_params=pltpu.CompilerParams(
            dimension_semantics=("parallel", "parallel", "arbitrary"),
            vmem_limit_bytes=vmem_limit),
    )(lens, *args)

    return out[:, :Lq, :] if Lq_pad != Lq else out


# ----------------------------------------------------------------------------
# Pure-JAX reference mirroring the PyTorch module (dropout = identity).
# TODO(synk): training-mode dropout is not implemented (forward matches eval()).
# ----------------------------------------------------------------------------
def _ref_mha(q, k, v, mask, p, heads):
    n, Lq, D = q.shape
    Lk = k.shape[1]
    d_k = D // heads
    hp = jax.lax.Precision.HIGHEST
    Q = (jnp.einsum("nld,de->nle", q, p["wq"], precision=hp) + p["bq"][0]) \
        .reshape(n, Lq, heads, d_k).transpose(0, 2, 1, 3)
    K = (jnp.einsum("nld,de->nle", k, p["wk"], precision=hp) + p["bk"][0]) \
        .reshape(n, Lk, heads, d_k).transpose(0, 2, 1, 3)
    V = (jnp.einsum("nld,de->nle", v, p["wv"], precision=hp) + p["bv"][0]) \
        .reshape(n, Lk, heads, d_k).transpose(0, 2, 1, 3)
    s = jnp.einsum("nhqd,nhkd->nhqk", Q, K, precision=hp) / (d_k ** 0.5)
    if mask is not None:
        m = mask[:, 0] if mask.ndim == 4 else mask
        m = jnp.broadcast_to(m, (n, Lq, Lk))
        s = jnp.where(m[:, None, :, :] != 0, -MY_INF, s)
    probs = jax.nn.softmax(s, axis=-1)
    o = jnp.einsum("nhqk,nhkd->nhqd", probs, V, precision=hp)
    o = o.transpose(0, 2, 1, 3).reshape(n, Lq, D)
    return jnp.einsum("nld,de->nle", o, p["wo"], precision=hp) + p["bo"][0]


# ----------------------------------------------------------------------------
if __name__ == "__main__":
    heads, d_model = 4, 32
    n, q_len, k_len = 2, 8, 16

    key = jax.random.PRNGKey(0)
    keys = jax.random.split(key, 16)
    kit = iter(keys)

    def w(shape, kk):
        return jax.random.normal(kk, shape, jnp.float32) * 0.05

    # Linear weights stored [in, out] so y = x @ W + b (same math as nn.Linear).
    params = {
        "wq": w((d_model, d_model), next(kit)), "bq": w((1, d_model), next(kit)),
        "wk": w((d_model, d_model), next(kit)), "bk": w((1, d_model), next(kit)),
        "wv": w((d_model, d_model), next(kit)), "bv": w((1, d_model), next(kit)),
        "wo": w((d_model, d_model), next(kit)), "bo": w((1, d_model), next(kit)),
    }

    # One-time parameter prep (scale folding + dtype cast) outside the forward path.
    prep_bf16 = prepare_params(params, heads)                        # bf16 MXU operands
    prep_f32 = prepare_params(params, heads, compute_dtype=jnp.float32)

    # --- Test 1: self-attention, causal mask generated in-kernel (no mask DMA) ---
    x = jax.random.normal(next(kit), (n, q_len, d_model), jnp.float32)
    causal_bool = (jnp.arange(q_len)[:, None] < jnp.arange(q_len)[None, :])
    dst_mask = jnp.broadcast_to(causal_bool, (n, q_len, q_len))

    ref_self = _ref_mha(x, x, x, dst_mask, params, heads)
    out_self = jax.block_until_ready(
        multi_head_attention(x, x, x, prep_bf16, causal=True))
    assert out_self.shape == (n, q_len, d_model)
    assert jnp.allclose(out_self, ref_self, atol=3e-2, rtol=3e-2), "bf16 causal mismatch"

    out_self32 = jax.block_until_ready(
        multi_head_attention(x, x, x, prep_f32, causal=True))
    assert jnp.allclose(out_self32, ref_self, atol=5e-3, rtol=5e-3), "f32 causal mismatch"

    # --- Test 2: cross-attention, key-padding mask from per-batch lengths (SMEM) ---
    q2 = jax.random.normal(next(kit), (n, q_len, d_model), jnp.float32)
    k2 = jax.random.normal(next(kit), (n, k_len, d_model), jnp.float32)
    v2 = jax.random.normal(next(kit), (n, k_len, d_model), jnp.float32)
    lens = jnp.array([k_len, 11], jnp.int32)
    pad = jnp.arange(k_len)[None, :] >= lens[:, None]
    cross_mask = jnp.broadcast_to(pad[:, None, :], (n, q_len, k_len))

    ref_cross = _ref_mha(q2, k2, v2, cross_mask, params, heads)
    out_cross = jax.block_until_ready(
        multi_head_attention(q2, k2, v2, prep_bf16, kv_lens=lens))
    assert jnp.allclose(out_cross, ref_cross, atol=3e-2, rtol=3e-2), "padding mismatch"

    # --- Test 3: no mask -> masking code is compiled out entirely ---
    ref_nm = _ref_mha(q2, k2, v2, None, params, heads)
    out_nm = jax.block_until_ready(multi_head_attention(q2, k2, v2, prep_bf16))
    assert jnp.allclose(out_nm, ref_nm, atol=3e-2, rtol=3e-2), "no-mask mismatch"

    # --- Test 4: explicit dense bool mask path (int8 DMA), same as torch mask arg ---
    out_dense = jax.block_until_ready(
        multi_head_attention(x, x, x, prep_bf16, mask=dst_mask))
    assert jnp.allclose(out_dense, ref_self, atol=3e-2, rtol=3e-2), "dense-mask mismatch"

    print("KERNEL_OK")
</pallas_src>

<mosaic_0001>
module attributes {stable_mosaic.version = 11 : i64} {
  func.func @_kv_proj_kernel(%arg0: i32, %arg1: i32, %arg2: memref<1x8x32xbf16, #tpu.memory_space<vmem>>, %arg3: memref<1x8x32xbf16, #tpu.memory_space<vmem>>, %arg4: memref<32x32xbf16, #tpu.memory_space<vmem>>, %arg5: memref<1x32xbf16, #tpu.memory_space<vmem>>, %arg6: memref<32x32xbf16, #tpu.memory_space<vmem>>, %arg7: memref<1x32xbf16, #tpu.memory_space<vmem>>, %arg8: memref<1x8x32xbf16, #tpu.memory_space<vmem>>, %arg9: memref<1x8x32xbf16, #tpu.memory_space<vmem>>) attributes {dimension_semantics = [#tpu.dimension_semantics<parallel>, #tpu.dimension_semantics<parallel>], iteration_bounds = array<i64: 2, 1>, scalar_prefetch = 0 : i64, scratch_operands = 0 : i64, tpu.core_type = #tpu.core_type<tc>, window_params = [{transform_indices = @transform_0, window_bounds = array<i64: 1, 8, 32>}, {transform_indices = @transform_1, window_bounds = array<i64: 1, 8, 32>}, {pipeline_mode = #tpu.pipeline_mode<synchronous>, transform_indices = @transform_2, window_bounds = array<i64: 32, 32>}, {pipeline_mode = #tpu.pipeline_mode<synchronous>, transform_indices = @transform_3, window_bounds = array<i64: 1, 32>}, {pipeline_mode = #tpu.pipeline_mode<synchronous>, transform_indices = @transform_4, window_bounds = array<i64: 32, 32>}, {pipeline_mode = #tpu.pipeline_mode<synchronous>, transform_indices = @transform_5, window_bounds = array<i64: 1, 32>}, {transform_indices = @transform_6, window_bounds = array<i64: 1, 8, 32>}, {transform_indices = @transform_7, window_bounds = array<i64: 1, 8, 32>}]} {
    %c0 = arith.constant 0 : index
    %c0_0 = arith.constant 0 : index
    %c0_1 = arith.constant 0 : index
    %0 = vector.load %arg2[%c0, %c0_0, %c0_1] : memref<1x8x32xbf16, #tpu.memory_space<vmem>>, vector<1x8x32xbf16>
    %1 = vector.shape_cast %0 : vector<1x8x32xbf16> to vector<8x32xbf16>
    %c0_2 = arith.constant 0 : index
    %c0_3 = arith.constant 0 : index
    %c0_4 = arith.constant 0 : index
    %2 = vector.load %arg3[%c0_2, %c0_3, %c0_4] : memref<1x8x32xbf16, #tpu.memory_space<vmem>>, vector<1x8x32xbf16>
    %3 = vector.shape_cast %2 : vector<1x8x32xbf16> to vector<8x32xbf16>
    %c0_5 = arith.constant 0 : index
    %c0_6 = arith.constant 0 : index
    %4 = vector.load %arg4[%c0_5, %c0_6] : memref<32x32xbf16, #tpu.memory_space<vmem>>, vector<32x32xbf16>
    %cst = arith.constant dense<0.000000e+00> : vector<8x32xf32>
    %5 = tpu.matmul %1, %4, %cst {dimension_numbers = #tpu.dot_dimension_numbers<[1], [0], [0], [1], [0, 0, 1, 1], [], []>} : vector<8x32xbf16>, vector<32x32xbf16>, vector<8x32xf32> -> vector<8x32xf32>
    %c0_7 = arith.constant 0 : index
    %c0_8 = arith.constant 0 : index
    %6 = vector.load %arg5[%c0_7, %c0_8] : memref<1x32xbf16, #tpu.memory_space<vmem>>, vector<1x32xbf16>
    %7 = arith.extf %6 : vector<1x32xbf16> to vector<1x32xf32>
    %8 = vector.broadcast %7 : vector<1x32xf32> to vector<8x32xf32>
    %9 = arith.addf %5, %8 : vector<8x32xf32>
    %10 = arith.truncf %9 : vector<8x32xf32> to vector<8x32xbf16>
    %c0_9 = arith.constant 0 : index
    %c0_10 = arith.constant 0 : index
    %c0_11 = arith.constant 0 : index
    %11 = vector.load %arg8[%c0_9, %c0_10, %c0_11] : memref<1x8x32xbf16, #tpu.memory_space<vmem>>, vector<1x8x32xbf16>
    %12 = vector.shape_cast %11 : vector<1x8x32xbf16> to vector<8x32xbf16>
    %13 = vector.shape_cast %10 : vector<8x32xbf16> to vector<1x8x32xbf16>
    tpu.vector_store %arg8[%c0_9, %c0_10, %c0_11], %13 {strides = array<i32>} : memref<1x8x32xbf16, #tpu.memory_space<vmem>>, vector<1x8x32xbf16>,
    %c0_12 = arith.constant 0 : index
    %c0_13 = arith.constant 0 : index
    %14 = vector.load %arg6[%c0_12, %c0_13] : memref<32x32xbf16, #tpu.memory_space<vmem>>, vector<32x32xbf16>
    %cst_14 = arith.constant dense<0.000000e+00> : vector<8x32xf32>
    %15 = tpu.matmul %3, %14, %cst_14 {dimension_numbers = #tpu.dot_dimension_numbers<[1], [0], [0], [1], [0, 0, 1, 1], [], []>} : vector<8x32xbf16>, vector<32x32xbf16>, vector<8x32xf32> -> vector<8x32xf32>
    %c0_15 = arith.constant 0 : index
    %c0_16 = arith.constant 0 : index
    %16 = vector.load %arg7[%c0_15, %c0_16] : memref<1x32xbf16, #tpu.memory_space<vmem>>, vector<1x32xbf16>
    %17 = arith.extf %16 : vector<1x32xbf16> to vector<1x32xf32>
    %18 = vector.broadcast %17 : vector<1x32xf32> to vector<8x32xf32>
    %19 = arith.addf %15, %18 : vector<8x32xf32>
    %20 = arith.truncf %19 : vector<8x32xf32> to vector<8x32xbf16>
    %c0_17 = arith.constant 0 : index
    %c0_18 = arith.constant 0 : index
    %c0_19 = arith.constant 0 : index
    %21 = vector.load %arg9[%c0_17, %c0_18, %c0_19] : memref<1x8x32xbf16, #tpu.memory_space<vmem>>, vector<1x8x32xbf16>
    %22 = vector.shape_cast %21 : vector<1x8x32xbf16> to vector<8x32xbf16>
    %23 = vector.shape_cast %20 : vector<8x32xbf16> to vector<1x8x32xbf16>
    tpu.vector_store %arg9[%c0_17, %c0_18, %c0_19], %23 {strides = array<i32>} : memref<1x8x32xbf16, #tpu.memory_space<vmem>>, vector<1x8x32xbf16>,
    return
  }
  func.func @transform_0(%arg0: i32, %arg1: i32) -> (i32, i32, i32) {
    %c0_i32 = arith.constant 0 : i32
    %c0_i32_0 = arith.constant 0 : i32
    return %arg0, %arg1, %c0_i32 : i32, i32, i32
  }
  func.func @transform_1(%arg0: i32, %arg1: i32) -> (i32, i32, i32) {
    %c0_i32 = arith.constant 0 : i32
    %c0_i32_0 = arith.constant 0 : i32
    return %arg0, %arg1, %c0_i32 : i32, i32, i32
  }
  func.func @transform_2(%arg0: i32, %arg1: i32) -> (i32, i32) {
    %c0_i32 = arith.constant 0 : i32
    %c0_i32_0 = arith.constant 0 : i32
    %c0_i32_1 = arith.constant 0 : i32
    return %c0_i32, %c0_i32_0 : i32, i32
  }
  func.func @transform_3(%arg0: i32, %arg1: i32) -> (i32, i32) {
    %c0_i32 = arith.constant 0 : i32
    %c0_i32_0 = arith.constant 0 : i32
    %c0_i32_1 = arith.constant 0 : i32
    return %c0_i32, %c0_i32_0 : i32, i32
  }
  func.func @transform_4(%arg0: i32, %arg1: i32) -> (i32, i32) {
    %c0_i32 = arith.constant 0 : i32
    %c0_i32_0 = arith.constant 0 : i32
    %c0_i32_1 = arith.constant 0 : i32
    return %c0_i32, %c0_i32_0 : i32, i32
  }
  func.func @transform_5(%arg0: i32, %arg1: i32) -> (i32, i32) {
    %c0_i32 = arith.constant 0 : i32
    %c0_i32_0 = arith.constant 0 : i32
    %c0_i32_1 = arith.constant 0 : i32
    return %c0_i32, %c0_i32_0 : i32, i32
  }
  func.func @transform_6(%arg0: i32, %arg1: i32) -> (i32, i32, i32) {
    %c0_i32 = arith.constant 0 : i32
    %c0_i32_0 = arith.constant 0 : i32
    return %arg0, %arg1, %c0_i32 : i32, i32, i32
  }
  func.func @transform_7(%arg0: i32, %arg1: i32) -> (i32, i32, i32) {
    %c0_i32 = arith.constant 0 : i32
    %c0_i32_0 = arith.constant 0 : i32
    return %arg0, %arg1, %c0_i32 : i32, i32, i32
  }
}

</mosaic_0001>

<bundles_post_ra>
// kernel: tpu_custom_call.1
= control target key start
LH: loop header
LB: loop body
LE: loop exit
PB: predicated region body
PF: predicated region fallthrough
CT: control target
= control target key end

     0   :  { %s1499_s0 = inlined_call_operand.hbm [shape: bf16[2,8,32], index: 0, kind: input, shape index: {}]   ;;  %s1500_s1 = inlined_call_operand.hbm [shape: bf16[2,8,32], index: 1, kind: input, shape index: {}]   ;;  %s1501_s2 = inlined_call_operand.hbm [shape: bf16[32,32], index: 2, kind: input, shape index: {}]   ;;  %s1502_s3 = inlined_call_operand.vmem [shape: bf16[1,32], index: 3, kind: input, shape index: {}]   ;;  %s1503_s4 = inlined_call_operand.hbm [shape: bf16[32,32], index: 4, kind: input, shape index: {}]   ;;  %s1504_s5 = inlined_call_operand.vmem [shape: bf16[1,32], index: 5, kind: input, shape index: {}]   ;;  %s1505_s6 = inlined_call_operand.hbm [shape: bf16[2,8,32], index: 6, kind: output, shape index: {0}]   ;;  %s1506_s7 = inlined_call_operand.hbm [shape: bf16[2,8,32], index: 7, kind: output, shape index: {1}]  }
   0x1   :  { %1514 = sst [smem:[#allocation23_spill]] %s1501_s2 }
   0x2   :  { %1515 = sst [smem:[#allocation24_spill]] %s1503_s4 }
   0x3   :  { %13 = vsyncpa [#allocation3], 0 }
   0x4   :  { %15 = vsyncpa [#allocation3 + $0x1], 0 }
   0x5   :  { %16 = vsyncpa [#allocation6], 0 }
   0x6   :  { %18 = vsyncpa [#allocation6 + $0x1], 0 }
   0x7   :  { %19 = vsyncpa [#allocation9], 0 }
   0x8   :  { %20 = vsyncpa [#allocation4], 0 }
   0x9   :  { %22 = vsyncpa [#allocation4 + $0x1], 0 }
   0xa   :  { %23 = vsyncpa [#allocation12], 0 }
   0xb   :  { %25 = vsyncpa [#allocation12 + $0x1], 0  ;;  %s1168_s24 = smov 0   ;;  %s1170_s25 = smov 0  }
   0xc   :  { %s1172_s26 = smov 0   ;;  %s1174_s27 = smov 0  }
   0xd   :  { %s1176_s28 = smov 0   ;;  %s1178_s29 = smov 0  }
   0xe LB: > { %1516 = sst [smem:[#allocation19_spill]] %s1112_s28  ;;  %s1199_s30 = sadd.s32 4294967295, %s1116_s29   ;;  %s1116_s29 = sphi %s1178_s29, %s31_s29   ;;  %s1112_s28 = sphi %s1176_s28, %s1541_s28   ;;  %s1108_s27 = sphi %s1174_s27, %s1540_s27   ;;  %s1104_s26 = sphi %s1172_s26, %s1544_s26   ;;  %s1100_s25 = sphi %s1170_s25, %s1543_s25   ;;  %s1096_s24 = sphi %s1168_s24, %s1542_s24  }
   0xf   : > { %s723_s8 = sadd.s32 4294967294, %s1116_s29   ;;  %p65_p0 = scmp.ne.s32.totalorder %s1100_s25, %s1096_s24 }
  0x10   : > { %p1507_p1 = scmp.eq.s32.totalorder %s1199_s30, 0  ;;  %p209_p3 = scmp.eq.s32.totalorder %s723_s8, 1 }
  0x11   : > { %p724_p5 = scmp.ge.s32.totalorder %s1116_s29, 1  ;;  %p244_p7 = scmp.lt.s32.totalorder %s1116_s29, 3 }
  0x12   : > { %p1208_p4 = por %p1507_p1, %p65_p0  ;;  %p1213_p6 = por %p209_p3, %p65_p0 }
  0x13   : > { %p1218_p8 = pnand %p724_p5, %p244_p7  ;;  %s1118_s12 = smov [#allocation7]  }
  0x14   : > { %s1517_s9 = scalar_select %p1208_p4, 1, 0 }
  0x15   : > { %s1518_s10 = scalar_select %p1213_p6, 1, 0 }
  0x16   : > { %s1520_s11 = scalar_select %p1218_p8, 1, 0 }
  0x17   : > { %1519 = sst [smem:[#allocation20_spill]] %s1518_s10  ;;  %s256_s13 = sshll.u32 %s1118_s12, 4  ;;  %s1222_s13 = int_to_ptr.vmem [resolvable:$true] %s256_s13 }
  0x18   : > { %p789_p9 = pneg %p1218_p8  ;;  %s1119_s15 = smov [#allocation8]  }
  0x19   : > { %s272_s16 = sshll.u32 %s1119_s15, 4  ;;  %s1522_s2 = sld [smem:[#allocation23_spill]]  ;;  %s1233_s16 = int_to_ptr.vmem [resolvable:$true] %s272_s16 }
  0x1a   : > { %p1229_p11 = pnand %p789_p9, %p1507_p1 }
  0x1c   : > { %p876_p13 = pneg %p1229_p11 }
  0x1f   : > { %s874_s19 = scalar_lea.hbm %s1522_s2, 256 }
  0x20   : > { %p875_p12 = scmp.ne.s32.totalorder %s1522_s2, %s874_s19  ;;  %p881_p5 = scmp.lt.u32.totalorder %s874_s19, %s1522_s2 }
  0x22   : > { %p877_p0 = pnand %p876_p13, %p875_p12 }
  0x24   : > { %p878_p3 = pneg %p877_p0 }
  0x26   : > { %p883_p7 = pnand %p881_p5, %p878_p3 }
  0x28   : > { %886 = shalt.err (!%p883_p7)
}
  0x29   : > { %s887_s8 = scalar_lea.vmem %s1222_s13, 256  ;;  %p895_p2 = scmp.lt.s32.totalorder %s1222_s13, %s1222_s13 }
  0x2a   : > { %p888_p9 = scmp.ne.s32.totalorder %s1222_s13, %s887_s8  ;;  %p896_p12 = scmp.lt.s32.totalorder %s887_s8, %s887_s8 }
  0x2c   : > { %p890_p10 = pnand %p888_p9, %p876_p13  ;;  %p897_p0 = por %p896_p12, %p895_p2 }
  0x2e   : > { %p891_p1 = pneg %p890_p10 }
  0x30   : > { %p898_p6 = pnand %p897_p0, %p891_p1 }
  0x32   : > { %901 = shalt.err (!%p898_p6)
}
  0x33   : > { %s1120_s12 = smov 64   ;;  %s1121_s15 = smov 4  }
  0x34   : > { %792 = dma.hbm_to_vmem [thread:$0]  (!%p1229_p11), %s1522_s2, 256, %s1222_s13, [#allocation6], %s1120_s12, %s1120_s12, %s1121_s15  }
  0x35   : > { %s1523_s4 = sld [smem:[#allocation24_spill]] }
  0x3b   : > { %s902_s21 = scalar_lea.hbm %s1523_s4, 256 }
  0x3c   : > { %p903_p2 = scmp.ne.s32.totalorder %s1523_s4, %s902_s21  ;;  %p909_p10 = scmp.lt.u32.totalorder %s902_s21, %s1523_s4 }
  0x3e   : > { %p905_p1 = pnand %p903_p2, %p876_p13 }
  0x40   : > { %p906_p6 = pneg %p905_p1 }
  0x42   : > { %p911_p3 = pnand %p909_p10, %p906_p6 }
  0x44   : > { %914 = shalt.err (!%p911_p3)
}
  0x45   : > { %s915_s13 = scalar_lea.vmem %s1233_s16, 256  ;;  %p923_p12 = scmp.lt.s32.totalorder %s1233_s16, %s1233_s16 }
  0x46   : > { %p916_p5 = scmp.ne.s32.totalorder %s1233_s16, %s915_s13  ;;  %p924_p0 = scmp.lt.s32.totalorder %s915_s13, %s915_s13 }
  0x48   : > { %p918_p7 = pnand %p916_p5, %p876_p13  ;;  %p925_p2 = por %p924_p0, %p923_p12 }
  0x4a   : > { %p919_p9 = pneg %p918_p7 }
  0x4c   : > { %p926_p1 = pnand %p925_p2, %p919_p9 }
  0x4e   : > { %929 = shalt.err (!%p926_p1)
}
  0x4f   : > { %795 = dma.hbm_to_vmem [thread:$0]  (!%p1229_p11), %s1523_s4, 256, %s1233_s16, [#allocation9], %s1120_s12, %s1120_s12, %s1121_s15  }
  0x50   : > { %s43_s18 = sadd.s32 1, %s1112_s28  ;;  %s52_s19 = sadd.s32 1, %s1104_s26 }
  0x51   : > { %p45_p13 = scmp.ge.s32.totalorder %s43_s18, 2  ;;  %p59_p6 = scmp.ne.s32.totalorder %s1104_s26, %s1100_s25 }
  0x52   : > { %p60_p10 = scmp.eq.s32.totalorder %s1116_s29, 0  ;;  %p812_p3 = scmp.lt.s32.totalorder %s1116_s29, 2 }
  0x53   : > { %s1546_s18 = smov (%p45_p13, %s43_s18), 0  ;;  %p1525_p7 = scmp.eq.s32.totalorder %s1199_s30, 1 }
  0x54   : > { %1524 = sst [smem:[#allocation21_spill]] %s1546_s18  ;;  %p61_p5 = por %p60_p10, %p59_p6 }
  0x55   : > { %p1297_p9 = por %p1525_p7, %p59_p6  ;;  %s47_s20 = ssub.s32 %s1112_s28, %s1546_s18 }
  0x56   : > { %s289_s21 = sand.u32 1, %s1104_s26   ;;  %p50_p12 = scmp.eq.s32.totalorder %s47_s20, 0 }
  0x57   : > { %s1526_s14 = scalar_select %p1297_p9, 1, 0 }
  0x58   : > { %s1304_s16 = sshll.u32 %s289_s21, 2  ;;  %s729_s12 = sshll.u32 %s1112_s28, 6 }
  0x59   : > { %s1308_s15 = scalar_select %p50_p12, %s1104_s26, %s52_s19  }
  0x5a   : > { %s1313_s8 = scalar_lea.hbm %s1499_s0, %s729_s12  ;;  %s293_s13 = scalar_lea.vmem [#allocation2], %s1304_s16 }
  0x5b   : > { %1527 = sst [smem:[#allocation22_spill]] %s1308_s15  ;;  %s301_s10 = sshll.u32 %s293_s13, 4  ;;  %s1322_s10 = int_to_ptr.vmem [resolvable:$true] %s301_s10 }
  0x5c   : > { %p1318_p11 = pnand %p812_p3, %p61_p5  ;;  %s1327_s22 = scalar_lea.hbm %s1500_s1, %s729_s12 }
  0x5d   : > { %s290_s23 = scalar_lea.sflag [#allocation3], %s289_s21  ;;  %s930_s2 = scalar_lea.hbm %s1313_s8, 64 }
  0x5e   : > { %p931_p0 = scmp.ne.s32.totalorder %s1313_s8, %s930_s2  ;;  %p932_p2 = pneg %p1318_p11 }
  0x5f   : > { %s935_s18 = scalar_lea.hbm %s1499_s0, 128  ;;  %p936_p6 = scmp.lt.u32.totalorder %s1313_s8, %s1499_s0 }
  0x60   : > { %p933_p1 = pnand %p932_p2, %p931_p0  ;;  %p937_p10 = scmp.lt.u32.totalorder %s935_s18, %s930_s2 }
  0x61   : > { %p939_p5 = scmp.lt.u32.totalorder %s930_s2, %s1313_s8 }
  0x62   : > { %p934_p13 = pneg %p933_p1  ;;  %p938_p3 = por %p937_p10, %p936_p6 }
  0x64   : > { %p940_p7 = por %p939_p5, %p938_p3 }
  0x66   : > { %p941_p12 = pnand %p940_p7, %p934_p13 }
  0x68   : > { %944 = shalt.err (!%p941_p12)
}
  0x69   : > { %s945_s21 = scalar_lea.vmem %s1322_s10, 64  ;;  %s1122_s4 = smov [#allocation2]  }
  0x6a   : > { %p946_p0 = scmp.ne.s32.totalorder %s1322_s10, %s945_s21  ;;  %s950_s12 = sshll.u32 %s1122_s4, 4  ;;  %s951_s12 = int_to_ptr.vmem [resolvable:$false] %s950_s12 }
  0x6b   : > { %s952_s28 = scalar_lea.vmem %s951_s12, 128  ;;  %p953_p4 = scmp.lt.s32.totalorder %s1322_s10, %s951_s12 }
  0x6c   : > { %p948_p1 = pnand %p946_p0, %p932_p2  ;;  %p954_p6 = scmp.lt.s32.totalorder %s952_s28, %s945_s21 }
  0x6e   : > { %p949_p9 = pneg %p948_p1  ;;  %p955_p10 = por %p954_p6, %p953_p4 }
  0x70   : > { %p956_p3 = pnand %p955_p10, %p949_p9 }
  0x72   : > { %959 = shalt.err (!%p956_p3)
}
  0x73   : > { %799 = dma.hbm_to_vmem [thread:$0]  (!%p1318_p11), %s1313_s8, 64, %s1322_s10, %s290_s23  }
  0x74   : > { %s308_s2 = sand.u32 1, %s1116_s29   ;;  %s312_s18 = scalar_lea.vmem [#allocation5], %s1304_s16 }
  0x75   : > { %s320_s15 = sshll.u32 %s312_s18, 4  ;;  %s309_s19 = scalar_lea.sflag [#allocation6], %s308_s2  ;;  %s321_s15 = int_to_ptr.vmem [resolvable:$true] %s320_s15 }
  0x76   : > { %s960_s20 = scalar_lea.hbm %s1327_s22, 64  ;;  %s965_s4 = scalar_lea.hbm %s1500_s1, 128 }
  0x77   : > { %p961_p4 = scmp.ne.s32.totalorder %s1327_s22, %s960_s20  ;;  %p966_p5 = scmp.lt.u32.totalorder %s1327_s22, %s1500_s1 }
  0x78   : > { %p967_p7 = scmp.lt.u32.totalorder %s965_s4, %s960_s20  ;;  %p969_p0 = scmp.lt.u32.totalorder %s960_s20, %s1327_s22 }
  0x79   : > { %p963_p9 = pnand %p961_p4, %p932_p2 }
  0x7a   : > { %p968_p12 = por %p967_p7, %p966_p5 }
  0x7b   : > { %p964_p13 = pneg %p963_p9 }
  0x7c   : > { %p970_p1 = por %p969_p0, %p968_p12 }
  0x7e   : > { %p971_p6 = pnand %p970_p1, %p964_p13 }
  0x80   : > { %974 = shalt.err (!%p971_p6)
}
  0x81   : > { %s975_s16 = scalar_lea.vmem %s321_s15, 64  ;;  %s1123_s8 = smov [#allocation5]  }
  0x82   : > { %p976_p10 = scmp.ne.s32.totalorder %s321_s15, %s975_s16  ;;  %s980_s10 = sshll.u32 %s1123_s8, 4  ;;  %s981_s10 = int_to_ptr.vmem [resolvable:$false] %s980_s10 }
  0x83   : > { %s982_s23 = scalar_lea.vmem %s981_s10, 128  ;;  %p983_p9 = scmp.lt.s32.totalorder %s321_s15, %s981_s10 }
  0x84   : > { %p978_p3 = pnand %p976_p10, %p932_p2  ;;  %p984_p8 = scmp.lt.s32.totalorder %s982_s23, %s975_s16 }
  0x86   : > { %p979_p4 = pneg %p978_p3  ;;  %p985_p5 = por %p984_p8, %p983_p9 }
  0x88   : > { %p986_p7 = pnand %p985_p5, %p979_p4 }
  0x8a   : > { %989 = shalt.err (!%p986_p7)
}
  0x8b   : > { %802 = dma.hbm_to_vmem [thread:$0]  (!%p1318_p11), %s1327_s22, 64, %s321_s15, %s309_s19  }
  0x8c   : > { %p1529_p13 = scmp.ne.s32.totalorder %s1520_s11, 0 }
  0x8d   : > { %s1378_s2 = sand.u32 (!%p1529_p13), 1, %s1100_s25   ;;  %p1530_p8 = scmp.ne.s32.totalorder (!%p1529_p13), %s1517_s9, 0 }
  0x8e   : > { %329 = sbr.rel (%p1529_p13) target bundleno = 423 (0x1a7), region = 44  ;;  %s1381_s18 = sshll.u32 (!%p1529_p13), %s1378_s2, 2 }
  0x8f   : > { %s332_s20 = scalar_lea.sflag (!%p1529_p13), [#allocation3], %s1378_s2  ;;  %s335_s13 = scalar_lea.vmem (!%p1529_p13), [#allocation2], %s1381_s18 }
  0x95   : > { %1071 = dma.done.wait (%p1530_p8), %s332_s20, 64  }
  0x96   : > { %1073 = vsyncadd (%p1530_p8), %s332_s20, 4294967232  ;;  %s340_s11 = sand.u32 1, %s1199_s30   ;;  %s344_s22 = scalar_lea.vmem [#allocation5], %s1381_s18 }
  0x97   : > { %s341_s17 = scalar_lea.sflag [#allocation6], %s340_s11 }
  0x98   : > { %1075 = dma.done.wait (%p1530_p8), %s341_s17, 64  }
  0x99   : > { %1077 = vsyncadd (%p1530_p8), %s341_s17, 4294967232  ;;  %p1531_p11 = scmp.eq.s32.totalorder %s1199_s30, 0 }
  0x9b   : > { %1079 = dma.done.wait (%p1531_p11), [#allocation6], 256   ;;  %p1532_p2 = pmov %p1531_p11 }
  0x9d   : > { %1081 = vsyncadd (%p1532_p2), [#allocation6], 4294967040  ;;  %p1533_p12 = pmov %p1532_p2 }
  0x9e   : > { %p1534_p0 = pmov %p1532_p2 }
  0x9f   : > { %1083 = dma.done.wait (%p1533_p12), [#allocation9], 256  }
  0xa0   : > { %1085 = vsyncadd (%p1534_p0), [#allocation9], 4294967040  ;;  %v1124_v0 = vmov 0.0   ;;  %vm1125_vm0 = vmmov 0   ;;  %v870_v1 = vld [vmem:[#allocation7] sm:$0xff]   ;;  %v871_v2 = vld [vmem:[#allocation8] sm:$0xff]   ;;  %v402_v7 = vlaneseq }
  0xa1   : > { %757 = vmatprep.subr.bf16.mxu0 %v1124_v0  ;;  %765 = vmatprep.subr.bf16.mxu1 %v1124_v0  ;;  %v872_v3 = vld [vmem:[#allocation7 + $0x8] sm:$0xff]   ;;  %v873_v4 = vld [vmem:[#allocation8 + $0x8] sm:$0xff]   ;;  %v394_v5 = vld [vmem:[%s335_s13] sm:$0xf]  ;;  %vm418_vm1 = vcmask 261120   ;;  %s747_s21 = sshll.u32 %s1108_s27, 6 }
  0xa2   : > { %761 = vmatprep.mubr.msk.bf16.mxu0 %vm1125_vm0, %v1124_v0  ;;  %769 = vmatprep.mubr.msk.bf16.mxu1 %vm1125_vm0, %v1124_v0  ;;  %v395_v6 = vld [vmem:[%s344_s22] sm:$0xf]  ;;  %v403_v8 = vshrl.u32 %v402_v7, 7  ;;  %v400_v9 = vld [vmem:[%s1502_s3] sm:$0x1]  ;;  %s385_s4 = scalar_lea.vmem [#allocation10], %s1381_s18  ;;  %s1417_s23 = scalar_lea.hbm %s1505_s6, %s747_s21 }
  0xa3   : > { %758 = vmatpush3.bf16.msra.mxu0 %v870_v1  ;;  %766 = vmatpush3.bf16.msra.mxu1 %v871_v2  ;;  %v469_v10 = vld [vmem:[%s1504_s5] sm:$0x1]  ;;  %v401_v11 = vunpack.c.l.bf16 %v400_v9  ;;  %s552_s12 = sshll.u32 %s385_s4, 4  ;;  %s392_s28 = scalar_lea.vmem [#allocation11], %s1381_s18  ;;  %vm463_vm2 = vcmask 257024   ;;  %s1419_s12 = int_to_ptr.vmem [resolvable:$true] %s552_s12 }
  0xa4   : > { %759 = vmatprep.subr.bf16.mxu0 %v1124_v0  ;;  %767 = vmatprep.subr.bf16.mxu1 %v1124_v0  ;;  %v404_v12 = vsub.s32 0, %v403_v8  ;;  %v470_v13 = vunpack.c.l.bf16 %v469_v10  ;;  %s566_s16 = sshll.u32 %s392_s28, 4  ;;  %s1424_s13 = scalar_lea.hbm %s1506_s7, %s747_s21  ;;  %s1426_s16 = int_to_ptr.vmem [resolvable:$true] %s566_s16 }
  0xa5   : > { %s533_s11 = scalar_lea.sflag [#allocation4], %s1378_s2  ;;  %s990_s17 = scalar_lea.vmem %s1419_s12, 64 }
  0xa6   : > { %v405_v14 = vrot.slane %v401_v11, %v404_v12  ;;  %v474_v15 = vrot.slane %v470_v13, %v404_v12  ;;  %p991_p1 = scmp.ne.s32.totalorder %s1419_s12, %s990_s17  ;;  %p1535_p6 = scmp.ne.s32.totalorder %s1526_s14, 0 }
  0xa7   : > { %760 = vmatpush3.bf16.msra.mxu0 %v872_v3  ;;  %768 = vmatpush3.bf16.msra.mxu1 %v873_v4  ;;  %s1126_s22 = smov [#allocation10]  }
  0xa8   : > { %p992_p10 = pnand %p991_p1, %p1535_p6  ;;  %s994_s30 = sshll.u32 %s1126_s22, 4  ;;  %s995_s30 = int_to_ptr.vmem [resolvable:$false] %s994_s30 }
  0xa9   : > { %s996_s9 = scalar_lea.vmem %s995_s30, 128  ;;  %p997_p4 = scmp.lt.s32.totalorder %s1419_s12, %s995_s30 }
  0xaa   : > { %762 = vmatmul.mubr.msk.bf16.vlgmr.msra.gmra.mrb[0].mxu0 %vm418_vm1, %v394_v5  ;;  %770 = vmatmul.mubr.msk.bf16.vlgmr.msra.gmra.mrb[0].mxu1 %vm418_vm1, %v395_v6  ;;  %p993_p3 = pneg %p992_p10  ;;  %p998_p9 = scmp.lt.s32.totalorder %s996_s9, %s990_s17 }
  0xac   : > { %p999_p5 = por %p998_p9, %p997_p4 }
  0xae   : > { %p1000_p7 = pnand %p999_p5, %p993_p3 }
 0x17d   : > { %v456_v16 = vpop.f32.mrb[0].mxu0  ;;  %v524_v18 = vpop.f32.mrb[0].mxu1 }
 0x17e   : > { %v457_v17 = vadd.f32 %v456_v16, %v405_v14  ;;  %v763_v19 = vpop.f32.mrb[1].mxu0  ;;  %v525_v20 = vadd.f32 %v524_v18, %v474_v15  ;;  %v771_v21 = vpop.f32.mrb[1].mxu1 }
 0x17f   : > { %v459_v22 = vpop.f32.mrb[2].mxu0  ;;  %v527_v24 = vpop.f32.mrb[2].mxu1 }
 0x180   : > { %v462_v23 = vpack.c.bf16 %v457_v17, %v457_v17  ;;  %v764_v25 = vpop.f32.mrb[3].mxu0  ;;  %v530_v26 = vpack.c.bf16 %v525_v20, %v525_v20  ;;  %v772_v27 = vpop.f32.mrb[3].mxu1 }
 0x182   : > { %464 = vst.msk [vmem:[%s385_s4] sm:$0xf] %vm463_vm2, %v462_v23 }
 0x183   : > { %1003 = shalt.err (!%p1000_p7)
}
 0x184   : > { %s1004_s15 = scalar_lea.hbm %s1417_s23, 64  ;;  %s1008_s4 = scalar_lea.hbm %s1505_s6, 128 }
 0x185   : > { %p1005_p13 = scmp.ne.s32.totalorder %s1417_s23, %s1004_s15  ;;  %p1009_p2 = scmp.lt.u32.totalorder %s1417_s23, %s1505_s6 }
 0x186   : > { %p1010_p12 = scmp.lt.u32.totalorder %s1008_s4, %s1004_s15  ;;  %p1012_p1 = scmp.lt.u32.totalorder %s1004_s15, %s1417_s23 }
 0x187   : > { %p1006_p8 = pnand %p1005_p13, %p1535_p6 }
 0x188   : > { %p1011_p0 = por %p1010_p12, %p1009_p2 }
 0x189   : > { %p1007_p11 = pneg %p1006_p8 }
 0x18a   : > { %p1013_p10 = por %p1012_p1, %p1011_p0 }
 0x18c   : > { %p1014_p3 = pnand %p1013_p10, %p1007_p11 }
 0x18e   : > { %1017 = shalt.err (!%p1014_p3)
}
 0x18f   : > { %785 = dma.vmem_to_hbm [thread:$0]  (%p1535_p6), %s1419_s12, 64, %s1417_s23, %s533_s11   ;;  %531 = vst.msk [vmem:[%s392_s28] sm:$0xf] %vm463_vm2, %v530_v26 }
 0x190   : > { %s538_s27 = scalar_lea.sflag [#allocation12], %s1378_s2  ;;  %s1018_s20 = scalar_lea.vmem %s1426_s16, 64 }
 0x191   : > { %p1019_p4 = scmp.ne.s32.totalorder %s1426_s16, %s1018_s20  ;;  %s1127_s17 = smov [#allocation11]  }
 0x192   : > { %s1022_s22 = sshll.u32 %s1127_s17, 4  ;;  %s1023_s22 = int_to_ptr.vmem [resolvable:$false] %s1022_s22 }
 0x193   : > { %p1020_p9 = pnand %p1019_p4, %p1535_p6  ;;  %s1024_s30 = scalar_lea.vmem %s1023_s22, 128 }
 0x194   : > { %p1025_p7 = scmp.lt.s32.totalorder %s1426_s16, %s1023_s22  ;;  %p1026_p13 = scmp.lt.s32.totalorder %s1024_s30, %s1018_s20 }
 0x195   : > { %p1021_p5 = pneg %p1020_p9 }
 0x196   : > { %p1027_p8 = por %p1026_p13, %p1025_p7 }
 0x198   : > { %p1028_p11 = pnand %p1027_p8, %p1021_p5 }
 0x19a   : > { %1031 = shalt.err (!%p1028_p11)
}
 0x19b   : > { %s1032_s2 = scalar_lea.hbm %s1424_s13, 64  ;;  %s1036_s28 = scalar_lea.hbm %s1506_s7, 128 }
 0x19c   : > { %p1033_p2 = scmp.ne.s32.totalorder %s1424_s13, %s1032_s2  ;;  %p1037_p1 = scmp.lt.u32.totalorder %s1424_s13, %s1506_s7 }
 0x19d   : > { %p1038_p10 = scmp.lt.u32.totalorder %s1036_s28, %s1032_s2  ;;  %p1040_p4 = scmp.lt.u32.totalorder %s1032_s2, %s1424_s13 }
 0x19e   : > { %p1034_p12 = pnand %p1033_p2, %p1535_p6 }
 0x19f   : > { %p1039_p3 = por %p1038_p10, %p1037_p1 }
 0x1a0   : > { %p1035_p0 = pneg %p1034_p12 }
 0x1a1   : > { %p1041_p9 = por %p1040_p4, %p1039_p3 }
 0x1a3   : > { %p1042_p5 = pnand %p1041_p9, %p1035_p0 }
 0x1a5   : > { %1045 = shalt.err (!%p1042_p5)
}
 0x1a6   : > { %786 = dma.vmem_to_hbm [thread:$0]  (%p1535_p6), %s1426_s16, 64, %s1424_s13, %s538_s27  }
 0x1a7 PF: > { %s1536_s9 = sld [smem:[#allocation20_spill]]  ;;  %s578_s15 = sand.u32 1, %s1096_s24  }
 0x1a8   : > { %p1538_p13 = scmp.ge.s32.totalorder %s1116_s29, 2  ;;  %s579_s19 = scalar_lea.sflag [#allocation4], %s578_s15 }
 0x1ad   : > { %p1537_p7 = scmp.ne.s32.totalorder %s1536_s9, 0 }
 0x1af   : > { %p804_p8 = pnand %p1538_p13, %p1537_p7 }
 0x1b1   : > { %1087 = dma.done.wait (!%p804_p8), %s579_s19, 64  }
 0x1b2   : > { %1089 = vsyncadd (!%p804_p8), %s579_s19, 4294967232  ;;  %s588_s21 = scalar_lea.sflag [#allocation12], %s578_s15 }
 0x1b3   : > { %1091 = dma.done.wait (!%p804_p8), %s588_s21, 64  }
 0x1b4   : > { %1093 = vsyncadd (!%p804_p8), %s588_s21, 4294967232  ;;  %s31_s29 = sadd.s32 1, %s1116_s29   ;;  %s1539_s14 = sld [smem:[#allocation22_spill]] }
 0x1b5   : > { %p28_p11 = scmp.ge.s32.totalorder %s31_s29, 4   ;;  %s1540_s27 = sld [smem:[#allocation19_spill]] }
 0x1b6   : > { %s1541_s28 = sld [smem:[#allocation21_spill]]  ;;  %s1542_s24 = smov %s1100_s25 }
 0x1b7   : > { %s1543_s25 = smov %s1104_s26  ;;  %30 = sbr.rel (!%p28_p11) target bundleno = 14 (0xe), region = 127 }
 0x1ba   : > { %s1544_s26 = smov %s1539_s14 }
 0x1be   :  { %593 = vsyncpa [#allocation3], 1 }
 0x1bf   :  { %595 = vsyncpa [#allocation3 + $0x1], 1 }
 0x1c0   :  { %596 = vsyncpa [#allocation6], 1 }
 0x1c1   :  { %598 = vsyncpa [#allocation6 + $0x1], 1 }
 0x1c2   :  { %599 = vsyncpa [#allocation9], 1 }
 0x1c3   :  { %600 = vsyncpa [#allocation4], 1 }
 0x1c4   :  { %602 = vsyncpa [#allocation4 + $0x1], 1 }
 0x1c5   :  { %603 = vsyncpa [#allocation12], 1 }
 0x1c6   :  { %605 = vsyncpa [#allocation12 + $0x1], 1 }

</bundles_post_ra>
